<compile_context>
chip_gen: v6e
topology: v6e:2x2x1
jax: 0.10.0
libtpu: 0.0.40
codegen_flags: <defaults>
</compile_context>

<pallas_src>
import jax
import jax.numpy as jnp
from jax.experimental import pallas as pl
from jax.experimental.pallas import tpu as pltpu

H1, H2 = 40, 30          # hidden widths of the PyTorch module
LANE = 128               # TPU lane width; padded feature dims use this
MAX_TILE_B = 1024        # batch tile cap (amortizes per-grid-step overhead)


def critic_kernel(s_ref, a_ref, w1_ref, w2s_ref, w2a_ref, vec_ref, q_ref):
    # Activations arrive f32 / narrow-lane; cast to bf16 only for the MXU.
    s = s_ref[...].astype(jnp.bfloat16)          # (TILE_B, s_dim)
    a = a_ref[...].astype(jnp.bfloat16)          # (TILE_B, a_dim)

    b1 = vec_ref[0:1, :]                         # (1, 128) f32, lanes >=40 are 0
    b2 = vec_ref[1:2, :]                         # (1, 128) f32, lanes >=30 are 0
    w3 = vec_ref[2:3, :]                         # (1, 128) f32, fc3 weight row
    b3 = vec_ref[3:4, 0:1]                       # (1, 1)   f32, fc3 bias

    # fc1 + relu -> (TILE_B, 128) f32; lanes >= 40 are exactly zero because the
    # padded weight columns / bias lanes are zero and ReLU preserves zero.
    h1 = jnp.dot(s, w1_ref[...], preferred_element_type=jnp.float32)
    h1 = jnp.maximum(h1 + b1, 0.0)

    # fc2 on concat([h1, a]) + relu; concat realized as a split matmul.
    h2 = (jnp.dot(h1.astype(jnp.bfloat16), w2s_ref[...],
                  preferred_element_type=jnp.float32) +
          jnp.dot(a, w2a_ref[...], preferred_element_type=jnp.float32))
    h2 = jnp.maximum(h2 + b2, 0.0)               # (TILE_B, 128) f32

    # fc3 (30 -> 1): elementwise mul (VPU) + lane reduction (XLU) in f32.
    q = jnp.sum(h2 * w3, axis=-1, keepdims=True) + b3
    q_ref[...] = q                               # (TILE_B, 1) f32


def _round_up(x, m):
    return ((x + m - 1) // m) * m


def critic_forward(s, a, packed_params):
    """Critic forward pass via a batch-tiled Pallas kernel. Returns (B, 1)."""
    w1, w2s, w2a, vec = packed_params
    B, s_dim = s.shape
    a_dim = a.shape[1]

    TILE_B = min(MAX_TILE_B, _round_up(B, 8))
    B_pad = _round_up(B, TILE_B)
    if B_pad != B:   # only pad when the batch doesn't tile exactly
        s = jnp.zeros((B_pad, s_dim), s.dtype).at[:B].set(s)
        a = jnp.zeros((B_pad, a_dim), a.dtype).at[:B].set(a)

    full = lambda i: (0, 0)   # weights/packed-vec: same full block every step

    q_pad = pl.pallas_call(
        critic_kernel,
        out_shape=jax.ShapeDtypeStruct((B_pad, 1), jnp.float32),
        grid=(B_pad // TILE_B,),
        in_specs=[
            pl.BlockSpec((TILE_B, s_dim), lambda i: (i, 0)),
            pl.BlockSpec((TILE_B, a_dim), lambda i: (i, 0)),
            pl.BlockSpec(w1.shape, full),
            pl.BlockSpec(w2s.shape, full),
            pl.BlockSpec(w2a.shape, full),
            pl.BlockSpec(vec.shape, full),
        ],
        out_specs=pl.BlockSpec((TILE_B, 1), lambda i: (i, 0)),
        compiler_params=pltpu.CompilerParams(
            dimension_semantics=("parallel",)),   # v7x: shard tiles over 2 TCs
    )(s, a, w1, w2s, w2a, vec)

    return q_pad[:B]


def init_params(key, s_dim, a_dim):
    """Returns (raw f32 params for the reference, packed kernel params)."""
    ks = jax.random.split(key, 6)

    # PyTorch nn.Linear default init: U(-1/sqrt(fan_in), 1/sqrt(fan_in)),
    # weights stored transposed as (in_features, out_features).
    def lin(kw, kb, fan_in, fan_out):
        bound = 1.0 / jnp.sqrt(jnp.float32(fan_in))
        w = jax.random.uniform(kw, (fan_in, fan_out), jnp.float32, -bound, bound)
        b = jax.random.uniform(kb, (1, fan_out), jnp.float32, -bound, bound)
        return w, b

    w1, b1 = lin(ks[0], ks[1], s_dim, H1)           # (s_dim, 40), (1, 40)
    w2, b2 = lin(ks[2], ks[3], H1 + a_dim, H2)      # (40+a_dim, 30), (1, 30)
    w3, b3 = lin(ks[4], ks[5], H2, 1)               # (30, 1), (1, 1)
    raw = (w1, b1, w2, b2, w3, b3)

    # --- kernel layout: lane-pad weight outputs to 128, bf16 matmul weights,
    #     f32 bias/fc3 vector params packed into one (8, 128) tile. -----------
    def pad_cols(x, cols):
        return jnp.zeros((x.shape[0], cols), x.dtype).at[:, :x.shape[1]].set(x)

    w1p = pad_cols(w1, LANE).astype(jnp.bfloat16)                  # (s_dim,128)
    w2sp = (jnp.zeros((LANE, LANE), jnp.float32)
            .at[:H1, :H2].set(w2[:H1, :]).astype(jnp.bfloat16))    # (128,128)
    w2ap = pad_cols(w2[H1:, :], LANE).astype(jnp.bfloat16)         # (a_dim,128)

    vec = jnp.zeros((8, LANE), jnp.float32)
    vec = vec.at[0, :H1].set(b1[0])            # row 0: fc1 bias
    vec = vec.at[1, :H2].set(b2[0])            # row 1: fc2 bias
    vec = vec.at[2, :H2].set(w3[:, 0])         # row 2: fc3 weight row
    vec = vec.at[3, 0].set(b3[0, 0])           # row 3, lane 0: fc3 bias

    packed = (w1p, w2sp, w2ap, vec)
    return raw, packed


def critic_reference(s, a, raw):
    """Pure-JAX f32 reference matching the PyTorch module."""
    w1, b1, w2, b2, w3, b3 = raw
    h1 = jnp.maximum(s @ w1 + b1, 0.0)
    h2 = jnp.maximum(jnp.concatenate([h1, a], axis=1) @ w2 + b2, 0.0)
    return h2 @ w3 + b3


if __name__ == "__main__":
    key = jax.random.PRNGKey(0)
    k_s, k_a, k_p = jax.random.split(key, 3)

    B, s_dim, a_dim = 8, 16, 4
    s = jax.random.normal(k_s, (B, s_dim), jnp.float32)
    a = jax.random.normal(k_a, (B, a_dim), jnp.float32)
    raw, packed = init_params(k_p, s_dim, a_dim)

    q = critic_forward(s, a, packed)
    jax.block_until_ready(q)

    q_ref = critic_reference(s, a, raw)
    assert q.shape == (B, 1)
    # bf16 MXU operands => loosen tolerance vs the f32 reference.
    assert jnp.allclose(q, q_ref, atol=2e-2, rtol=2e-2), \
        float(jnp.max(jnp.abs(q - q_ref)))

    print("KERNEL_OK")
</pallas_src>

<mosaic_0001>
module attributes {stable_mosaic.version = 11 : i64} {
  func.func @critic_kernel(%arg0: i32, %arg1: memref<8x16xf32, #tpu.memory_space<vmem>>, %arg2: memref<8x4xf32, #tpu.memory_space<vmem>>, %arg3: memref<16x128xbf16, #tpu.memory_space<vmem>>, %arg4: memref<128x128xbf16, #tpu.memory_space<vmem>>, %arg5: memref<4x128xbf16, #tpu.memory_space<vmem>>, %arg6: memref<8x128xf32, #tpu.memory_space<vmem>>, %arg7: memref<8x1xf32, #tpu.memory_space<vmem>>) attributes {dimension_semantics = [#tpu.dimension_semantics<parallel>], iteration_bounds = array<i64: 1>, scalar_prefetch = 0 : i64, scratch_operands = 0 : i64, tpu.core_type = #tpu.core_type<tc>, window_params = [{transform_indices = @transform_0, window_bounds = array<i64: 8, 16>}, {transform_indices = @transform_1, window_bounds = array<i64: 8, 4>}, {pipeline_mode = #tpu.pipeline_mode<synchronous>, transform_indices = @transform_2, window_bounds = array<i64: 16, 128>}, {pipeline_mode = #tpu.pipeline_mode<synchronous>, transform_indices = @transform_3, window_bounds = array<i64: 128, 128>}, {pipeline_mode = #tpu.pipeline_mode<synchronous>, transform_indices = @transform_4, window_bounds = array<i64: 4, 128>}, {pipeline_mode = #tpu.pipeline_mode<synchronous>, transform_indices = @transform_5, window_bounds = array<i64: 8, 128>}, {transform_indices = @transform_6, window_bounds = array<i64: 8, 1>}]} {
    %c0 = arith.constant 0 : index
    %c0_0 = arith.constant 0 : index
    %0 = vector.load %arg1[%c0, %c0_0] : memref<8x16xf32, #tpu.memory_space<vmem>>, vector<8x16xf32>
    %1 = arith.truncf %0 : vector<8x16xf32> to vector<8x16xbf16>
    %c0_1 = arith.constant 0 : index
    %c0_2 = arith.constant 0 : index
    %2 = vector.load %arg2[%c0_1, %c0_2] : memref<8x4xf32, #tpu.memory_space<vmem>>, vector<8x4xf32>
    %3 = arith.truncf %2 : vector<8x4xf32> to vector<8x4xbf16>
    %c0_3 = arith.constant 0 : index
    %c0_4 = arith.constant 0 : index
    %4 = vector.load %arg6[%c0_3, %c0_4] : memref<8x128xf32, #tpu.memory_space<vmem>>, vector<1x128xf32>
    %c1 = arith.constant 1 : index
    %c0_5 = arith.constant 0 : index
    %5 = vector.load %arg6[%c1, %c0_5] : memref<8x128xf32, #tpu.memory_space<vmem>>, vector<1x128xf32>
    %c2 = arith.constant 2 : index
    %c0_6 = arith.constant 0 : index
    %6 = vector.load %arg6[%c2, %c0_6] : memref<8x128xf32, #tpu.memory_space<vmem>>, vector<1x128xf32>
    %c3 = arith.constant 3 : index
    %c0_7 = arith.constant 0 : index
    %7 = vector.load %arg6[%c3, %c0_7] : memref<8x128xf32, #tpu.memory_space<vmem>>, vector<1x1xf32>
    %c0_8 = arith.constant 0 : index
    %c0_9 = arith.constant 0 : index
    %8 = vector.load %arg3[%c0_8, %c0_9] : memref<16x128xbf16, #tpu.memory_space<vmem>>, vector<16x128xbf16>
    %cst = arith.constant dense<0.000000e+00> : vector<8x128xf32>
    %9 = tpu.matmul %1, %8, %cst {dimension_numbers = #tpu.dot_dimension_numbers<[1], [0], [0], [1], [0, 0, 1, 1], [], []>} : vector<8x16xbf16>, vector<16x128xbf16>, vector<8x128xf32> -> vector<8x128xf32>
    %10 = vector.broadcast %4 : vector<1x128xf32> to vector<8x128xf32>
    %11 = arith.addf %9, %10 : vector<8x128xf32>
    %cst_10 = arith.constant 0.000000e+00 : f32
    %12 = vector.broadcast %cst_10 : f32 to vector<8x128xf32>
    %13 = arith.maximumf %11, %12 : vector<8x128xf32>
    %14 = arith.truncf %13 : vector<8x128xf32> to vector<8x128xbf16>
    %c0_11 = arith.constant 0 : index
    %c0_12 = arith.constant 0 : index
    %15 = vector.load %arg4[%c0_11, %c0_12] : memref<128x128xbf16, #tpu.memory_space<vmem>>, vector<128x128xbf16>
    %cst_13 = arith.constant dense<0.000000e+00> : vector<8x128xf32>
    %16 = tpu.matmul %14, %15, %cst_13 {dimension_numbers = #tpu.dot_dimension_numbers<[1], [0], [0], [1], [0, 0, 1, 1], [], []>} : vector<8x128xbf16>, vector<128x128xbf16>, vector<8x128xf32> -> vector<8x128xf32>
    %c0_14 = arith.constant 0 : index
    %c0_15 = arith.constant 0 : index
    %17 = vector.load %arg5[%c0_14, %c0_15] : memref<4x128xbf16, #tpu.memory_space<vmem>>, vector<4x128xbf16>
    %cst_16 = arith.constant dense<0.000000e+00> : vector<8x128xf32>
    %18 = tpu.matmul %3, %17, %cst_16 {dimension_numbers = #tpu.dot_dimension_numbers<[1], [0], [0], [1], [0, 0, 1, 1], [], []>} : vector<8x4xbf16>, vector<4x128xbf16>, vector<8x128xf32> -> vector<8x128xf32>
    %19 = arith.addf %16, %18 : vector<8x128xf32>
    %20 = vector.broadcast %5 : vector<1x128xf32> to vector<8x128xf32>
    %21 = arith.addf %19, %20 : vector<8x128xf32>
    %cst_17 = arith.constant 0.000000e+00 : f32
    %22 = vector.broadcast %cst_17 : f32 to vector<8x128xf32>
    %23 = arith.maximumf %21, %22 : vector<8x128xf32>
    %24 = vector.broadcast %6 : vector<1x128xf32> to vector<8x128xf32>
    %25 = arith.mulf %23, %24 : vector<8x128xf32>
    %cst_18 = arith.constant dense<0.000000e+00> : vector<8xf32>
    %26 = vector.multi_reduction <add>, %25, %cst_18 [1] : vector<8x128xf32> to vector<8xf32>
    %27 = vector.shape_cast %26 : vector<8xf32> to vector<8x1xf32>
    %28 = vector.broadcast %7 : vector<1x1xf32> to vector<8x1xf32>
    %29 = arith.addf %27, %28 : vector<8x1xf32>
    %c0_19 = arith.constant 0 : index
    %c0_20 = arith.constant 0 : index
    %30 = vector.load %arg7[%c0_19, %c0_20] : memref<8x1xf32, #tpu.memory_space<vmem>>, vector<8x1xf32>
    tpu.vector_store %arg7[%c0_19, %c0_20], %29 {strides = array<i32>} : memref<8x1xf32, #tpu.memory_space<vmem>>, vector<8x1xf32>,
    return
  }
  func.func @transform_0(%arg0: i32) -> (i32, i32) {
    %c0_i32 = arith.constant 0 : i32
    %c0_i32_0 = arith.constant 0 : i32
    return %arg0, %c0_i32 : i32, i32
  }
  func.func @transform_1(%arg0: i32) -> (i32, i32) {
    %c0_i32 = arith.constant 0 : i32
    %c0_i32_0 = arith.constant 0 : i32
    return %arg0, %c0_i32 : i32, i32
  }
  func.func @transform_2(%arg0: i32) -> (i32, i32) {
    %c0_i32 = arith.constant 0 : i32
    %c0_i32_0 = arith.constant 0 : i32
    %c0_i32_1 = arith.constant 0 : i32
    return %c0_i32, %c0_i32_0 : i32, i32
  }
  func.func @transform_3(%arg0: i32) -> (i32, i32) {
    %c0_i32 = arith.constant 0 : i32
    %c0_i32_0 = arith.constant 0 : i32
    %c0_i32_1 = arith.constant 0 : i32
    return %c0_i32, %c0_i32_0 : i32, i32
  }
  func.func @transform_4(%arg0: i32) -> (i32, i32) {
    %c0_i32 = arith.constant 0 : i32
    %c0_i32_0 = arith.constant 0 : i32
    %c0_i32_1 = arith.constant 0 : i32
    return %c0_i32, %c0_i32_0 : i32, i32
  }
  func.func @transform_5(%arg0: i32) -> (i32, i32) {
    %c0_i32 = arith.constant 0 : i32
    %c0_i32_0 = arith.constant 0 : i32
    %c0_i32_1 = arith.constant 0 : i32
    return %c0_i32, %c0_i32_0 : i32, i32
  }
  func.func @transform_6(%arg0: i32) -> (i32, i32) {
    %c0_i32 = arith.constant 0 : i32
    %c0_i32_0 = arith.constant 0 : i32
    return %arg0, %c0_i32 : i32, i32
  }
}

</mosaic_0001>

<bundles_post_ra>
// kernel: tpu_custom_call.1
= control target key start
LH: loop header
LB: loop body
LE: loop exit
PB: predicated region body
PF: predicated region fallthrough
CT: control target
= control target key end

     0   :  { %11 = vsyncpa [#allocation3], 0  ;;  %s490_s0 = inlined_call_operand.vmem [shape: f32[8,16], index: 0, kind: input, shape index: {}]   ;;  %s491_s1 = inlined_call_operand.vmem [shape: f32[8,4], index: 1, kind: input, shape index: {}]   ;;  %s492_s2 = inlined_call_operand.hbm [shape: bf16[16,128], index: 2, kind: input, shape index: {}]   ;;  %s493_s3 = inlined_call_operand.hbm [shape: bf16[128,128], index: 3, kind: input, shape index: {}]   ;;  %s494_s4 = inlined_call_operand.vmem [shape: bf16[4,128], index: 4, kind: input, shape index: {}]   ;;  %s495_s5 = inlined_call_operand.vmem [shape: f32[8,128], index: 5, kind: input, shape index: {}]   ;;  %s496_s6 = inlined_call_operand.vmem [shape: f32[8,1], index: 6, kind: output, shape index: {}]  }
   0x1   :  { %12 = vsyncpa [#allocation5], 0  ;;  %s416_s21 = smov [#allocation2]  }
   0x2   :  { %s22_s22 = sshll.u32 %s416_s21, 4  ;;  %s23_s22 = int_to_ptr.vmem [resolvable:$true] %s22_s22 }
   0x3   :  { %s380_s23 = scalar_lea.vmem %s23_s22, 128  ;;  %p385_p1 = scmp.lt.s32.totalorder %s23_s22, %s23_s22 }
   0x4   :  { %p381_p0 = scmp.ne.s32.totalorder %s23_s22, %s380_s23  ;;  %p386_p2 = scmp.lt.s32.totalorder %s380_s23, %s380_s23 }
   0x6   :  { %p387_p3 = por %p386_p2, %p385_p1 }
   0x8   :  { %p388_p4 = pnand %p387_p3, %p381_p0 }
   0xa   :  { %391 = shalt.err (!%p388_p4)
}
   0xb   :  { %s417_s24 = smov 64   ;;  %s418_s25 = smov 4  }
   0xc   :  { %28 = dma.hbm_to_vmem [thread:$0]  %s492_s2, 128, %s23_s22, [#allocation3], %s417_s24, %s417_s24, %s418_s25  }
   0xd   :  { %s419_s28 = smov [#allocation4]  }
   0xe   :  { %s34_s29 = sshll.u32 %s419_s28, 4  ;;  %s35_s29 = int_to_ptr.vmem [resolvable:$true] %s34_s29 }
   0xf   :  { %s400_s30 = scalar_lea.vmem %s35_s29, 1024  ;;  %p405_p6 = scmp.lt.s32.totalorder %s35_s29, %s35_s29 }
  0x10   :  { %p401_p5 = scmp.ne.s32.totalorder %s35_s29, %s400_s30  ;;  %p406_p7 = scmp.lt.s32.totalorder %s400_s30, %s400_s30 }
  0x12   :  { %p407_p8 = por %p406_p7, %p405_p6 }
  0x14   :  { %p408_p9 = pnand %p407_p8, %p401_p5 }
  0x16   :  { %411 = shalt.err (!%p408_p9)
}
  0x17   :  { %40 = dma.hbm_to_vmem [thread:$0]  %s493_s3, 1024, %s35_s29, [#allocation5], %s417_s24, %s417_s24, %s418_s25  }
  0x18   :  { %412 = dma.done.wait [#allocation3], 128  }
  0x19   :  { %413 = vsyncadd [#allocation3], 4294967168 }
  0x1a   :  { %414 = dma.done.wait [#allocation5], 1024  }
  0x1b   :  { %415 = vsyncadd [#allocation5], 4294966272  ;;  %v420_v0 = vmov 0.0   ;;  %vm421_vm0 = vmmov 0   ;;  %v363_v1 = vld [vmem:[#allocation2] sm:$0xff]   ;;  %vm72_vm1 = vcmask 130048  }
  0x1c   :  { %325 = vmatprep.subr.bf16.mxu1 %v420_v0  ;;  %327 = vmatprep.mubr.msk.bf16.mxu1 %vm421_vm0, %v420_v0  ;;  %v52_v2 = vld [vmem:[%s490_s0] sm:$0xff]  ;;  %v365_v5 = vld [vmem:[#allocation4 + $0x30] sm:$0xff]   ;;  %vm139_vm2 = vcmask 1041408   ;;  %v366_v7 = vld [vmem:[#allocation4 + $0x28] sm:$0xff]   ;;  %vm135_vm3 = vcmask 31744   ;;  %vm289_vm4 = vcmask 7168  }
  0x1d   :  { %337 = vmatprep.subr.bf16.mxu0 %v420_v0  ;;  %353 = vmatprep.mubr.msk.bf16.mxu0 %vm421_vm0, %v420_v0  ;;  %v53_v3 = vpack.c.bf16 %v52_v2, %v52_v2  ;;  %v364_v4 = vld [vmem:[#allocation4 + $0x38] sm:$0xff]   ;;  %v367_v9 = vld [vmem:[#allocation4 + $0x20] sm:$0xff]   ;;  %v369_v11 = vld [vmem:[#allocation4 + $0x10] sm:$0xff]  }
  0x1e   :  { %326 = vmatpush3.bf16.msra.mxu1 %v363_v1  ;;  %338 = vmatpush3.bf16.msra.mxu0 %v364_v4  ;;  %v134_v6 = vld [vmem:[%s494_s4] sm:$0x3]  ;;  %v370_v12 = vld [vmem:[#allocation4 + $0x8] sm:$0xff]   ;;  %v371_v15 = vld [vmem:[#allocation4] sm:$0xff]  }
  0x1f   :  { %331 = vmatprep.subr.bf16.mxu1 %v420_v0  ;;  %339 = vmatprep.subr.bf16.mxu0 %v420_v0  ;;  %v141_v8 = vsel %vm139_vm2, %v134_v6, 0  ;;  %v368_v10 = vld [vmem:[#allocation4 + $0x18] sm:$0xff]  }
  0x20   :  { %v54_v13 = vld [vmem:[%s491_s1] sm:$0xff] }
  0x21   :  { %328 = vmatmul.mubr.msk.bf16.vlgmr.msra.gmra.mxu1 %vm72_vm1, %v53_v3  ;;  %v55_v14 = vpack.c.bf16 %v54_v13, %v54_v13  ;;  %v297_v16 = vld [vmem:[%s495_s5] ss:$0 sm:$0xff]  ;;  %v309_v29 = vld [vmem:[%s495_s5 + $0x1] ss:$0 sm:$0xff]  ;;  %v310_v34 = vld [vmem:[%s495_s5 + $0x2] ss:$0 sm:$0xff] }
  0x22   :  { %333 = vmatprep.mubr.msk.bf16.mxu1 %vm421_vm0, %v420_v0  ;;  %340 = vmatpush3.bf16.msra.mxu0 %v365_v5  ;;  %v311_v38 = vld [vmem:[%s495_s5 + $0x3] ss:$0 sm:$0xff] }
  0x23   :  { %341 = vmatprep.subr.bf16.mxu0 %v420_v0  ;;  %332 = vmatpush3.bf16.msra.mxu1 %v141_v8 }
  0x26   :  { %342 = vmatpush3.bf16.msra.mxu0 %v366_v7 }
  0x27   :  { %343 = vmatprep.subr.bf16.mxu0 %v420_v0 }
  0x29   :  { %334 = vmatmul.mubr.msk.bf16.vlgmr.msra.gmra.mxu1 %vm135_vm3, %v55_v14 }
  0x2a   :  { %344 = vmatpush3.bf16.msra.mxu0 %v367_v9 }
  0x2b   :  { %345 = vmatprep.subr.bf16.mxu0 %v420_v0 }
  0x2e   :  { %346 = vmatpush3.bf16.msra.mxu0 %v368_v10 }
  0x2f   :  { %347 = vmatprep.subr.bf16.mxu0 %v420_v0 }
  0x32   :  { %348 = vmatpush3.bf16.msra.mxu0 %v369_v11 }
  0x33   :  { %349 = vmatprep.subr.bf16.mxu0 %v420_v0 }
  0x36   :  { %350 = vmatpush3.bf16.msra.mxu0 %v370_v12 }
  0x37   :  { %351 = vmatprep.subr.bf16.mxu0 %v420_v0 }
  0x3a   :  { %352 = vmatpush3.bf16.msra.mxu0 %v371_v15 }
  0xe1   :  { %v110_v17 = vpop.f32.mrf.mxu1 }
  0xe2   :  { %v111_v18 = vadd.f32 %v297_v16, %v110_v17 }
  0xe3   :  { %v329_v19 = vpop.f32.mrf.mxu1 }
  0xe4   :  { %v116_v20 = vmax.f32 %v111_v18, 0.0 }
  0xe5   :  { %v113_v21 = vpop.f32.mrf.mxu1 }
  0xe6   :  { %v117_v22 = vpack.c.bf16 %v116_v20, %v116_v20 }
  0xe7   :  { %v330_v23 = vpop.f32.mrf.mxu1 }
  0xe8   :  { %354 = vmatmul.mubr.bf16.vlgmr.msra.gmra.mxu0 %v117_v22 }
  0xe9   :  { %v177_v24 = vpop.f32.mrf.mxu1 }
  0xeb   :  { %v335_v25 = vpop.f32.mrf.mxu1 }
  0xed   :  { %v180_v26 = vpop.f32.mrf.mxu1 }
  0xef   :  { %v336_v27 = vpop.f32.mrf.mxu1 }
 0x1a8   :  { %v265_v28 = vpop.f32.mrf.mxu0 }
 0x1a9   :  { %v266_v30 = vadd.f32 %v265_v28, %v177_v24 }
 0x1aa   :  { %v355_v31 = vpop.f32.mrf.mxu0 }
 0x1ab   :  { %v275_v32 = vadd.f32 %v309_v29, %v266_v30 }
 0x1ac   :  { %v268_v33 = vpop.f32.mrf.mxu0 }
 0x1ad   :  { %v276_v35 = vmax.f32 %v275_v32, 0.0 }
 0x1ae   :  { %v356_v36 = vpop.f32.mrf.mxu0 }
 0x1af   :  { %v281_v37 = vmul.f32 %v310_v34, %v276_v35 }
 0x1b1   :  { %282 = vadd.xlane.f32.xlu0 %v281_v37 }
 0x23a   :  { %v283_v39 = vpop.xlane.xlu0 %282 }
 0x23b   :  { %v288_v40 = vadd.f32 %v311_v38, %v283_v39 }
 0x23d   :  { %290 = vst.msk [vmem:[%s496_s6] sm:$0xff] %vm289_vm4, %v288_v40 }
 0x23e   :  { %295 = vsyncpa [#allocation3], 1 }
 0x23f   :  { %296 = vsyncpa [#allocation5], 1 }

</bundles_post_ra>
